<compile_context>
chip_gen: v6e
topology: v6e:2x2x1
jax: 0.10.0
libtpu: 0.0.40
codegen_flags: <defaults>
</compile_context>

<pallas_src>
import functools

import jax
import jax.numpy as jnp
from jax.experimental import pallas as pl
from jax.experimental.pallas import tpu as pltpu


def relunet_kernel(w1_ref, b1_ref, w2_ref, b2_ref, w3_ref, b3_ref, x_ref, o_ref):
    # x_ref: (2, TB) f32 VMEM tile  -- features on sublanes, batch on lanes.
    # w*_ref: flattened nn.Linear weights, row-major (out, in), in SMEM.
    x = [x_ref[k:k + 1, :] for k in range(2)]               # 2 x (1, TB)

    # Linear(2, 3) + ReLU  -- VPU broadcast FMAs with SMEM scalar weights.
    h1 = [
        jnp.maximum(x[0] * w1_ref[2 * j] + x[1] * w1_ref[2 * j + 1] + b1_ref[j], 0.0)
        for j in range(3)
    ]

    # Linear(3, 2) + ReLU
    h2 = [
        jnp.maximum(
            h1[0] * w2_ref[3 * j]
            + h1[1] * w2_ref[3 * j + 1]
            + h1[2] * w2_ref[3 * j + 2]
            + b2_ref[j],
            0.0,
        )
        for j in range(2)
    ]

    # Linear(2, 3)  (no activation)
    for j in range(3):
        o_ref[j:j + 1, :] = (
            h2[0] * w3_ref[2 * j] + h2[1] * w3_ref[2 * j + 1] + b3_ref[j]
        )


@functools.partial(jax.jit, static_argnames=("tb",))
def relunet_forward(x, w1, b1, w2, b2, w3, b3, *, tb=1024):
    """y = relu(relu(x@w1.T+b1)@w2.T+b2)@w3.T+b3, x: (B, 2) f32 -> (B, 3) f32."""
    B = x.shape[0]
    Bp = pl.cdiv(B, tb) * tb

    # Lane-dense layout: (features, batch), batch padded to a multiple of TB.
    xt = jnp.zeros((2, Bp), jnp.float32).at[:, :B].set(x.astype(jnp.float32).T)

    smem = pl.BlockSpec(memory_space=pltpu.MemorySpace.SMEM)
    out_t = pl.pallas_call(
        relunet_kernel,
        out_shape=jax.ShapeDtypeStruct((3, Bp), jnp.float32),
        grid=(Bp // tb,),
        in_specs=[
            smem, smem, smem, smem, smem, smem,               # weights & biases
            pl.BlockSpec((2, tb), lambda i: (0, i)),          # x tile (batch-tiled)
        ],
        out_specs=pl.BlockSpec((3, tb), lambda i: (0, i)),
        compiler_params=pltpu.CompilerParams(
            dimension_semantics=("parallel",)),               # megacore on v7x
    )(w1.reshape(-1), b1, w2.reshape(-1), b2, w3.reshape(-1), b3, xt)

    return out_t[:, :B].T                                     # (B, 3)


def make_params():
    # Deterministic weights, identical to the PyTorch module's __init__.
    w1 = jnp.array([[1.0, 2.0], [3.0, 4.0], [5.0, 6.0]], dtype=jnp.float32)     # (3, 2)
    b1 = jnp.array([1.0, 2.0, 3.0], dtype=jnp.float32)                           # (3,)
    w2 = jnp.array([1.0, 2.0, 3.0, -4.0, -5.0, -6.0],
                   dtype=jnp.float32).reshape(2, 3)                              # (2, 3)
    b2 = jnp.array([2.0, 3.0], dtype=jnp.float32)                                # (2,)
    w3 = jnp.array([[1.0, 2.0], [-3.0, -4.0], [-5.0, -6.0]], dtype=jnp.float32)  # (3, 2)
    b3 = jnp.array([1.0, 2.0, 3.0], dtype=jnp.float32)                           # (3,)
    return w1, b1, w2, b2, w3, b3


def reference_forward(x, w1, b1, w2, b2, w3, b3):
    h = jnp.maximum(x @ w1.T + b1, 0.0)
    h = jnp.maximum(h @ w2.T + b2, 0.0)
    return h @ w3.T + b3


if __name__ == "__main__":
    key = jax.random.PRNGKey(0)
    batch = 8
    x = jax.random.normal(key, (batch, 2), dtype=jnp.float32)

    params = make_params()

    out = jax.block_until_ready(relunet_forward(x, *params))
    ref = reference_forward(x, *params)

    assert out.shape == (batch, 3), out.shape
    assert jnp.allclose(out, ref, atol=1e-5, rtol=1e-5), (out, ref)

    print("KERNEL_OK")
</pallas_src>

<mosaic_0001>
module attributes {stable_mosaic.version = 11 : i64} {
  func.func @relunet_kernel(%arg0: i32, %arg1: memref<6xf32, #tpu.memory_space<smem>>, %arg2: memref<3xf32, #tpu.memory_space<smem>>, %arg3: memref<6xf32, #tpu.memory_space<smem>>, %arg4: memref<2xf32, #tpu.memory_space<smem>>, %arg5: memref<6xf32, #tpu.memory_space<smem>>, %arg6: memref<3xf32, #tpu.memory_space<smem>>, %arg7: memref<2x1024xf32, #tpu.memory_space<vmem>>, %arg8: memref<3x1024xf32, #tpu.memory_space<vmem>>) attributes {dimension_semantics = [#tpu.dimension_semantics<parallel>], iteration_bounds = array<i64: 1>, scalar_prefetch = 0 : i64, scratch_operands = 0 : i64, tpu.core_type = #tpu.core_type<tc>, window_params = [{transform_indices = @transform_0, window_bounds = array<i64: 6>}, {transform_indices = @transform_1, window_bounds = array<i64: 3>}, {transform_indices = @transform_2, window_bounds = array<i64: 6>}, {transform_indices = @transform_3, window_bounds = array<i64: 2>}, {transform_indices = @transform_4, window_bounds = array<i64: 6>}, {transform_indices = @transform_5, window_bounds = array<i64: 3>}, {transform_indices = @transform_6, window_bounds = array<i64: 2, 1024>}, {transform_indices = @transform_7, window_bounds = array<i64: 3, 1024>}]} {
    %c0 = arith.constant 0 : index
    %c0_0 = arith.constant 0 : index
    %0 = vector.load %arg7[%c0, %c0_0] : memref<2x1024xf32, #tpu.memory_space<vmem>>, vector<1x1024xf32>
    %c1 = arith.constant 1 : index
    %c0_1 = arith.constant 0 : index
    %1 = vector.load %arg7[%c1, %c0_1] : memref<2x1024xf32, #tpu.memory_space<vmem>>, vector<1x1024xf32>
    %c0_2 = arith.constant 0 : index
    %2 = memref.load %arg1[%c0_2] : memref<6xf32, #tpu.memory_space<smem>>
    %3 = vector.broadcast %2 : f32 to vector<1x1024xf32>
    %4 = arith.mulf %0, %3 : vector<1x1024xf32>
    %c1_3 = arith.constant 1 : index
    %5 = memref.load %arg1[%c1_3] : memref<6xf32, #tpu.memory_space<smem>>
    %6 = vector.broadcast %5 : f32 to vector<1x1024xf32>
    %7 = arith.mulf %1, %6 : vector<1x1024xf32>
    %8 = arith.addf %4, %7 : vector<1x1024xf32>
    %c0_4 = arith.constant 0 : index
    %9 = memref.load %arg2[%c0_4] : memref<3xf32, #tpu.memory_space<smem>>
    %10 = vector.broadcast %9 : f32 to vector<1x1024xf32>
    %11 = arith.addf %8, %10 : vector<1x1024xf32>
    %cst = arith.constant 0.000000e+00 : f32
    %12 = vector.broadcast %cst : f32 to vector<1x1024xf32>
    %13 = arith.maximumf %11, %12 : vector<1x1024xf32>
    %c2 = arith.constant 2 : index
    %14 = memref.load %arg1[%c2] : memref<6xf32, #tpu.memory_space<smem>>
    %15 = vector.broadcast %14 : f32 to vector<1x1024xf32>
    %16 = arith.mulf %0, %15 : vector<1x1024xf32>
    %c3 = arith.constant 3 : index
    %17 = memref.load %arg1[%c3] : memref<6xf32, #tpu.memory_space<smem>>
    %18 = vector.broadcast %17 : f32 to vector<1x1024xf32>
    %19 = arith.mulf %1, %18 : vector<1x1024xf32>
    %20 = arith.addf %16, %19 : vector<1x1024xf32>
    %c1_5 = arith.constant 1 : index
    %21 = memref.load %arg2[%c1_5] : memref<3xf32, #tpu.memory_space<smem>>
    %22 = vector.broadcast %21 : f32 to vector<1x1024xf32>
    %23 = arith.addf %20, %22 : vector<1x1024xf32>
    %cst_6 = arith.constant 0.000000e+00 : f32
    %24 = vector.broadcast %cst_6 : f32 to vector<1x1024xf32>
    %25 = arith.maximumf %23, %24 : vector<1x1024xf32>
    %c4 = arith.constant 4 : index
    %26 = memref.load %arg1[%c4] : memref<6xf32, #tpu.memory_space<smem>>
    %27 = vector.broadcast %26 : f32 to vector<1x1024xf32>
    %28 = arith.mulf %0, %27 : vector<1x1024xf32>
    %c5 = arith.constant 5 : index
    %29 = memref.load %arg1[%c5] : memref<6xf32, #tpu.memory_space<smem>>
    %30 = vector.broadcast %29 : f32 to vector<1x1024xf32>
    %31 = arith.mulf %1, %30 : vector<1x1024xf32>
    %32 = arith.addf %28, %31 : vector<1x1024xf32>
    %c2_7 = arith.constant 2 : index
    %33 = memref.load %arg2[%c2_7] : memref<3xf32, #tpu.memory_space<smem>>
    %34 = vector.broadcast %33 : f32 to vector<1x1024xf32>
    %35 = arith.addf %32, %34 : vector<1x1024xf32>
    %cst_8 = arith.constant 0.000000e+00 : f32
    %36 = vector.broadcast %cst_8 : f32 to vector<1x1024xf32>
    %37 = arith.maximumf %35, %36 : vector<1x1024xf32>
    %c0_9 = arith.constant 0 : index
    %38 = memref.load %arg3[%c0_9] : memref<6xf32, #tpu.memory_space<smem>>
    %39 = vector.broadcast %38 : f32 to vector<1x1024xf32>
    %40 = arith.mulf %13, %39 : vector<1x1024xf32>
    %c1_10 = arith.constant 1 : index
    %41 = memref.load %arg3[%c1_10] : memref<6xf32, #tpu.memory_space<smem>>
    %42 = vector.broadcast %41 : f32 to vector<1x1024xf32>
    %43 = arith.mulf %25, %42 : vector<1x1024xf32>
    %44 = arith.addf %40, %43 : vector<1x1024xf32>
    %c2_11 = arith.constant 2 : index
    %45 = memref.load %arg3[%c2_11] : memref<6xf32, #tpu.memory_space<smem>>
    %46 = vector.broadcast %45 : f32 to vector<1x1024xf32>
    %47 = arith.mulf %37, %46 : vector<1x1024xf32>
    %48 = arith.addf %44, %47 : vector<1x1024xf32>
    %c0_12 = arith.constant 0 : index
    %49 = memref.load %arg4[%c0_12] : memref<2xf32, #tpu.memory_space<smem>>
    %50 = vector.broadcast %49 : f32 to vector<1x1024xf32>
    %51 = arith.addf %48, %50 : vector<1x1024xf32>
    %cst_13 = arith.constant 0.000000e+00 : f32
    %52 = vector.broadcast %cst_13 : f32 to vector<1x1024xf32>
    %53 = arith.maximumf %51, %52 : vector<1x1024xf32>
    %c3_14 = arith.constant 3 : index
    %54 = memref.load %arg3[%c3_14] : memref<6xf32, #tpu.memory_space<smem>>
    %55 = vector.broadcast %54 : f32 to vector<1x1024xf32>
    %56 = arith.mulf %13, %55 : vector<1x1024xf32>
    %c4_15 = arith.constant 4 : index
    %57 = memref.load %arg3[%c4_15] : memref<6xf32, #tpu.memory_space<smem>>
    %58 = vector.broadcast %57 : f32 to vector<1x1024xf32>
    %59 = arith.mulf %25, %58 : vector<1x1024xf32>
    %60 = arith.addf %56, %59 : vector<1x1024xf32>
    %c5_16 = arith.constant 5 : index
    %61 = memref.load %arg3[%c5_16] : memref<6xf32, #tpu.memory_space<smem>>
    %62 = vector.broadcast %61 : f32 to vector<1x1024xf32>
    %63 = arith.mulf %37, %62 : vector<1x1024xf32>
    %64 = arith.addf %60, %63 : vector<1x1024xf32>
    %c1_17 = arith.constant 1 : index
    %65 = memref.load %arg4[%c1_17] : memref<2xf32, #tpu.memory_space<smem>>
    %66 = vector.broadcast %65 : f32 to vector<1x1024xf32>
    %67 = arith.addf %64, %66 : vector<1x1024xf32>
    %cst_18 = arith.constant 0.000000e+00 : f32
    %68 = vector.broadcast %cst_18 : f32 to vector<1x1024xf32>
    %69 = arith.maximumf %67, %68 : vector<1x1024xf32>
    %c0_19 = arith.constant 0 : index
    %70 = memref.load %arg5[%c0_19] : memref<6xf32, #tpu.memory_space<smem>>
    %71 = vector.broadcast %70 : f32 to vector<1x1024xf32>
    %72 = arith.mulf %53, %71 : vector<1x1024xf32>
    %c1_20 = arith.constant 1 : index
    %73 = memref.load %arg5[%c1_20] : memref<6xf32, #tpu.memory_space<smem>>
    %74 = vector.broadcast %73 : f32 to vector<1x1024xf32>
    %75 = arith.mulf %69, %74 : vector<1x1024xf32>
    %76 = arith.addf %72, %75 : vector<1x1024xf32>
    %c0_21 = arith.constant 0 : index
    %77 = memref.load %arg6[%c0_21] : memref<3xf32, #tpu.memory_space<smem>>
    %78 = vector.broadcast %77 : f32 to vector<1x1024xf32>
    %79 = arith.addf %76, %78 : vector<1x1024xf32>
    %c0_22 = arith.constant 0 : index
    %c0_23 = arith.constant 0 : index
    %80 = vector.load %arg8[%c0_22, %c0_23] : memref<3x1024xf32, #tpu.memory_space<vmem>>, vector<1x1024xf32>
    tpu.vector_store %arg8[%c0_22, %c0_23], %79 {strides = array<i32>} : memref<3x1024xf32, #tpu.memory_space<vmem>>, vector<1x1024xf32>,
    %c2_24 = arith.constant 2 : index
    %81 = memref.load %arg5[%c2_24] : memref<6xf32, #tpu.memory_space<smem>>
    %82 = vector.broadcast %81 : f32 to vector<1x1024xf32>
    %83 = arith.mulf %53, %82 : vector<1x1024xf32>
    %c3_25 = arith.constant 3 : index
    %84 = memref.load %arg5[%c3_25] : memref<6xf32, #tpu.memory_space<smem>>
    %85 = vector.broadcast %84 : f32 to vector<1x1024xf32>
    %86 = arith.mulf %69, %85 : vector<1x1024xf32>
    %87 = arith.addf %83, %86 : vector<1x1024xf32>
    %c1_26 = arith.constant 1 : index
    %88 = memref.load %arg6[%c1_26] : memref<3xf32, #tpu.memory_space<smem>>
    %89 = vector.broadcast %88 : f32 to vector<1x1024xf32>
    %90 = arith.addf %87, %89 : vector<1x1024xf32>
    %c1_27 = arith.constant 1 : index
    %c0_28 = arith.constant 0 : index
    %91 = vector.load %arg8[%c1_27, %c0_28] : memref<3x1024xf32, #tpu.memory_space<vmem>>, vector<1x1024xf32>
    tpu.vector_store %arg8[%c1_27, %c0_28], %90 {strides = array<i32>} : memref<3x1024xf32, #tpu.memory_space<vmem>>, vector<1x1024xf32>,
    %c4_29 = arith.constant 4 : index
    %92 = memref.load %arg5[%c4_29] : memref<6xf32, #tpu.memory_space<smem>>
    %93 = vector.broadcast %92 : f32 to vector<1x1024xf32>
    %94 = arith.mulf %53, %93 : vector<1x1024xf32>
    %c5_30 = arith.constant 5 : index
    %95 = memref.load %arg5[%c5_30] : memref<6xf32, #tpu.memory_space<smem>>
    %96 = vector.broadcast %95 : f32 to vector<1x1024xf32>
    %97 = arith.mulf %69, %96 : vector<1x1024xf32>
    %98 = arith.addf %94, %97 : vector<1x1024xf32>
    %c2_31 = arith.constant 2 : index
    %99 = memref.load %arg6[%c2_31] : memref<3xf32, #tpu.memory_space<smem>>
    %100 = vector.broadcast %99 : f32 to vector<1x1024xf32>
    %101 = arith.addf %98, %100 : vector<1x1024xf32>
    %c2_32 = arith.constant 2 : index
    %c0_33 = arith.constant 0 : index
    %102 = vector.load %arg8[%c2_32, %c0_33] : memref<3x1024xf32, #tpu.memory_space<vmem>>, vector<1x1024xf32>
    tpu.vector_store %arg8[%c2_32, %c0_33], %101 {strides = array<i32>} : memref<3x1024xf32, #tpu.memory_space<vmem>>, vector<1x1024xf32>,
    return
  }
  func.func @transform_0(%arg0: i32) -> i32 {
    %c0_i32 = arith.constant 0 : i32
    %c0_i32_0 = arith.constant 0 : i32
    return %c0_i32 : i32
  }
  func.func @transform_1(%arg0: i32) -> i32 {
    %c0_i32 = arith.constant 0 : i32
    %c0_i32_0 = arith.constant 0 : i32
    return %c0_i32 : i32
  }
  func.func @transform_2(%arg0: i32) -> i32 {
    %c0_i32 = arith.constant 0 : i32
    %c0_i32_0 = arith.constant 0 : i32
    return %c0_i32 : i32
  }
  func.func @transform_3(%arg0: i32) -> i32 {
    %c0_i32 = arith.constant 0 : i32
    %c0_i32_0 = arith.constant 0 : i32
    return %c0_i32 : i32
  }
  func.func @transform_4(%arg0: i32) -> i32 {
    %c0_i32 = arith.constant 0 : i32
    %c0_i32_0 = arith.constant 0 : i32
    return %c0_i32 : i32
  }
  func.func @transform_5(%arg0: i32) -> i32 {
    %c0_i32 = arith.constant 0 : i32
    %c0_i32_0 = arith.constant 0 : i32
    return %c0_i32 : i32
  }
  func.func @transform_6(%arg0: i32) -> (i32, i32) {
    %c0_i32 = arith.constant 0 : i32
    %c0_i32_0 = arith.constant 0 : i32
    return %c0_i32, %arg0 : i32, i32
  }
  func.func @transform_7(%arg0: i32) -> (i32, i32) {
    %c0_i32 = arith.constant 0 : i32
    %c0_i32_0 = arith.constant 0 : i32
    return %c0_i32, %arg0 : i32, i32
  }
}

</mosaic_0001>

<bundles_post_ra>
// kernel: relunet_forward.1
= control target key start
LH: loop header
LB: loop body
LE: loop exit
PB: predicated region body
PF: predicated region fallthrough
CT: control target
= control target key end

     0   :  { %12 = vsyncpa [#allocation3], 0  ;;  %s415_s0 = inlined_call_operand.vmem [shape: f32[6], index: 0, kind: input, shape index: {}]   ;;  %s416_s1 = inlined_call_operand.vmem [shape: f32[3], index: 1, kind: input, shape index: {}]   ;;  %s417_s2 = inlined_call_operand.vmem [shape: f32[6], index: 2, kind: input, shape index: {}]   ;;  %s418_s3 = inlined_call_operand.vmem [shape: f32[2], index: 3, kind: input, shape index: {}]   ;;  %s419_s4 = inlined_call_operand.vmem [shape: f32[6], index: 4, kind: input, shape index: {}]   ;;  %s420_s5 = inlined_call_operand.vmem [shape: f32[3], index: 5, kind: input, shape index: {}]   ;;  %s421_s6 = inlined_call_operand.vmem [shape: f32[2,1024], index: 6, kind: input, shape index: {}]   ;;  %s422_s7 = inlined_call_operand.vmem [shape: f32[3,1024], index: 7, kind: output, shape index: {}]  }
   0x1   :  { %13 = vsyncpa [#allocation5], 0 }
   0x2   :  { %14 = vsyncpa [#allocation8], 0  ;;  %s32_s26 = sshll.u32 %s416_s1, 4  ;;  %s33_s26 = int_to_ptr.vmem [resolvable:$true] %s32_s26 }
   0x3   :  { %15 = vsyncpa [#allocation11], 0  ;;  %s52_s29 = sshll.u32 %s418_s3, 4  ;;  %s235_s30 = scalar_lea.vmem %s33_s26, 16  ;;  %s53_s29 = int_to_ptr.vmem [resolvable:$true] %s52_s29 }
   0x4   :  { %p236_p0 = scmp.ne.s32.totalorder %s33_s26, %s235_s30  ;;  %p240_p1 = scmp.lt.s32.totalorder %s33_s26, %s33_s26 }
   0x5   :  { %p241_p2 = scmp.lt.s32.totalorder %s235_s30, %s235_s30 }
   0x7   :  { %p242_p3 = por %p241_p2, %p240_p1 }
   0x9   :  { %p243_p4 = pnand %p242_p3, %p236_p0 }
   0xb   :  { %246 = shalt.err (!%p243_p4)
}
   0xc   :  { %s315_s8 = smov [#allocation4]   ;;  %s247_s9 = scalar_lea.vmem %s53_s29, 16 }
   0xd   :  { %35 = dma.vmem_to_smem %s33_s26, 16, %s315_s8, [#allocation5]  }
   0xe   :  { %p248_p5 = scmp.ne.s32.totalorder %s53_s29, %s247_s9  ;;  %p252_p6 = scmp.lt.s32.totalorder %s53_s29, %s53_s29 }
   0xf   :  { %p253_p7 = scmp.lt.s32.totalorder %s247_s9, %s247_s9 }
  0x11   :  { %p254_p8 = por %p253_p7, %p252_p6 }
  0x13   :  { %p255_p9 = pnand %p254_p8, %p248_p5 }
  0x15   :  { %258 = shalt.err (!%p255_p9)
}
  0x16   :  { %s316_s1 = smov [#allocation7]   ;;  %s22_s11 = sshll.u32 %s415_s0, 4  ;;  %s23_s11 = int_to_ptr.vmem [resolvable:$true] %s22_s11 }
  0x17   :  { %55 = dma.vmem_to_smem %s53_s29, 16, %s316_s1, [#allocation8]  }
  0x18   :  { %s42_s14 = sshll.u32 %s417_s2, 4  ;;  %s259_s15 = scalar_lea.vmem %s23_s11, 16  ;;  %s43_s14 = int_to_ptr.vmem [resolvable:$true] %s42_s14 }
  0x19   :  { %p260_p10 = scmp.ne.s32.totalorder %s23_s11, %s259_s15  ;;  %p264_p11 = scmp.lt.s32.totalorder %s23_s11, %s23_s11 }
  0x1a   :  { %p265_p12 = scmp.lt.s32.totalorder %s259_s15, %s259_s15 }
  0x1c   :  { %p266_p13 = por %p265_p12, %p264_p11 }
  0x1e   :  { %p267_p0 = pnand %p266_p13, %p260_p10 }
  0x20   :  { %270 = shalt.err (!%p267_p0)
}
  0x21   :  { %s317_s16 = smov [#allocation2]   ;;  %s271_s17 = scalar_lea.vmem %s43_s14, 16 }
  0x22   :  { %25 = dma.vmem_to_smem %s23_s11, 16, %s317_s16, [#allocation3]  }
  0x23   :  { %p272_p1 = scmp.ne.s32.totalorder %s43_s14, %s271_s17  ;;  %p276_p2 = scmp.lt.s32.totalorder %s43_s14, %s43_s14 }
  0x24   :  { %p277_p3 = scmp.lt.s32.totalorder %s271_s17, %s271_s17 }
  0x26   :  { %p278_p4 = por %p277_p3, %p276_p2 }
  0x28   :  { %p279_p5 = pnand %p278_p4, %p272_p1 }
  0x2a   :  { %282 = shalt.err (!%p279_p5)
}
  0x2b   :  { %s318_s0 = smov [#allocation6]   ;;  %s62_s19 = sshll.u32 %s419_s4, 4  ;;  %s63_s19 = int_to_ptr.vmem [resolvable:$true] %s62_s19 }
  0x2c   :  { %45 = dma.vmem_to_smem %s43_s14, 16, %s318_s0, [#allocation5]  }
  0x2d   :  { %s72_s22 = sshll.u32 %s420_s5, 4  ;;  %s283_s23 = scalar_lea.vmem %s63_s19, 16  ;;  %s73_s22 = int_to_ptr.vmem [resolvable:$true] %s72_s22 }
  0x2e   :  { %p284_p6 = scmp.ne.s32.totalorder %s63_s19, %s283_s23  ;;  %p288_p7 = scmp.lt.s32.totalorder %s63_s19, %s63_s19 }
  0x2f   :  { %p289_p8 = scmp.lt.s32.totalorder %s283_s23, %s283_s23 }
  0x31   :  { %p290_p9 = por %p289_p8, %p288_p7 }
  0x33   :  { %p291_p10 = pnand %p290_p9, %p284_p6 }
  0x35   :  { %294 = shalt.err (!%p291_p10)
}
  0x36   :  { %s319_s24 = smov [#allocation9]   ;;  %s295_s25 = scalar_lea.vmem %s73_s22, 16 }
  0x37   :  { %65 = dma.vmem_to_smem %s63_s19, 16, %s319_s24, [#allocation8]  }
  0x38   :  { %p296_p11 = scmp.ne.s32.totalorder %s73_s22, %s295_s25  ;;  %p300_p12 = scmp.lt.s32.totalorder %s73_s22, %s73_s22 }
  0x39   :  { %p301_p13 = scmp.lt.s32.totalorder %s295_s25, %s295_s25 }
  0x3b   :  { %p302_p0 = por %p301_p13, %p300_p12 }
  0x3d   :  { %p303_p1 = pnand %p302_p0, %p296_p11 }
  0x3f   :  { %306 = shalt.err (!%p303_p1)
}
  0x40   :  { %s320_s4 = smov [#allocation10]  }
  0x41   :  { %75 = dma.vmem_to_smem %s73_s22, 16, %s320_s4, [#allocation11]  }
  0x42   :  { %307 = dma.done.wait [#allocation3], 16  }
  0x43   :  { %308 = vsyncadd [#allocation3], 4294967280 }
  0x44   :  { %309 = dma.done.wait [#allocation5], 32  }
  0x45   :  { %310 = vsyncadd [#allocation5], 4294967264 }
  0x46   :  { %311 = dma.done.wait [#allocation8], 32  }
  0x47   :  { %312 = vsyncadd [#allocation8], 4294967264 }
  0x48   :  { %313 = dma.done.wait [#allocation11], 16  }
  0x49   :  { %314 = vsyncadd [#allocation11], 4294967280 }
  0x4a   :  { %96 = sfence }
  0x4b   :  { %s100_s5 = sld [smem:[#allocation2]]  ;;  %v97_v0 = vld [vmem:[%s421_s6] ss:$2 sm:$0xff]  ;;  %v206_v1 = vld [vmem:[%s421_s6 + $0x1] ss:$2 sm:$0xff] }
  0x4c   :  { %s207_s26 = sld [smem:[#allocation2 + $0x1]] }
  0x4d   :  { %s107_s27 = sld [smem:[#allocation4]] }
  0x4e   :  { %s208_s28 = sld [smem:[#allocation2 + $0x2]] }
  0x4f   :  { %s209_s8 = sld [smem:[#allocation2 + $0x3]] }
  0x50   :  { %s210_s3 = sld [smem:[#allocation4 + $0x1]] }
  0x51   :  { %v101_v2 = vstv %s100_s5  ;;  %s211_s10 = sld [smem:[#allocation2 + $0x4]] }
  0x52   :  { %v102_v3 = vmul.f32 %v101_v2, %v97_v0  ;;  %v104_v4 = vstv %s207_s26  ;;  %s212_s11 = sld [smem:[#allocation2 + $0x5]] }
  0x53   :  { %v105_v5 = vmul.f32 %v206_v1, %v104_v4  ;;  %s385_s12 = sld [smem:[#allocation4 + $0x2]]  ;;  %v108_v6 = vstv %s107_s27 }
  0x54   :  { %v112_v7 = vstv %s208_s28  ;;  %s133_s13 = sld [smem:[#allocation6]] }
  0x55   :  { %v106_v8 = vadd.f32 %v105_v5, %v102_v3  ;;  %v113_v9 = vmul.f32 %v112_v7, %v97_v0  ;;  %v115_v10 = vstv %s209_s8  ;;  %s214_s14 = sld [smem:[#allocation6 + $0x1]] }
  0x56   :  { %v116_v11 = vmul.f32 %v206_v1, %v115_v10  ;;  %s387_s15 = sld [smem:[#allocation6 + $0x2]]  ;;  %v119_v13 = vstv %s210_s3 }
  0x57   :  { %v109_v12 = vadd.f32 %v108_v6, %v106_v8  ;;  %v123_v14 = vstv %s211_s10  ;;  %s389_s6 = sld [smem:[#allocation7]] }
  0x58   :  { %v117_v15 = vadd.f32 %v116_v11, %v113_v9  ;;  %v124_v16 = vmul.f32 %v123_v14, %v97_v0  ;;  %v126_v17 = vstv %s212_s11  ;;  %s216_s16 = sld [smem:[#allocation6 + $0x3]] }
  0x59   :  { %v110_v18 = vmax.f32 %v109_v12, 0.0  ;;  %v127_v19 = vmul.f32 %v206_v1, %v126_v17  ;;  %s217_s17 = sld [smem:[#allocation6 + $0x4]]  ;;  %v130_v21 = vstv %s385_s12 }
  0x5a   :  { %v120_v20 = vadd.f32 %v119_v13, %v117_v15  ;;  %v134_v22 = vstv %s133_s13  ;;  %s218_s0 = sld [smem:[#allocation6 + $0x5]] }
  0x5b   :  { %v128_v23 = vadd.f32 %v127_v19, %v124_v16  ;;  %v137_v24 = vstv %s214_s14  ;;  %s219_s2 = sld [smem:[#allocation7 + $0x1]]  ;;  %v135_v26 = vmul.f32 %v134_v22, %v110_v18 }
  0x5c   :  { %v121_v25 = vmax.f32 %v120_v20, 0.0  ;;  %s392_s18 = sld [smem:[#allocation9]]  ;;  %v141_v29 = vstv %s387_s15 }
  0x5d   :  { %v131_v27 = vadd.f32 %v130_v21, %v128_v23  ;;  %s394_s19 = sld [smem:[#allocation9 + $0x1]]  ;;  %v145_v39 = vstv %s389_s6 }
  0x5e   :  { %v138_v28 = vmul.f32 %v137_v24, %v121_v25  ;;  %v149_v30 = vstv %s216_s16  ;;  %s397_s20 = sld [smem:[#allocation10]] }
  0x5f   :  { %v132_v31 = vmax.f32 %v131_v27, 0.0  ;;  %v150_v32 = vmul.f32 %v149_v30, %v110_v18  ;;  %v152_v33 = vstv %s217_s17  ;;  %s221_s21 = sld [smem:[#allocation9 + $0x2]] }
  0x60   :  { %v139_v34 = vadd.f32 %v138_v28, %v135_v26  ;;  %v153_v35 = vmul.f32 %v152_v33, %v121_v25  ;;  %v156_v36 = vstv %s218_s0  ;;  %s222_s22 = sld [smem:[#allocation9 + $0x3]] }
  0x61   :  { %v142_v37 = vmul.f32 %v141_v29, %v132_v31  ;;  %v157_v38 = vmul.f32 %v156_v36, %v132_v31  ;;  %s399_s23 = sld [smem:[#allocation10 + $0x1]]  ;;  %v160_v42 = vstv %s219_s2 }
  0x62   :  { %v154_v40 = vadd.f32 %v153_v35, %v150_v32  ;;  %s225_s24 = sld [smem:[#allocation9 + $0x4]]  ;;  %v164_v46 = vstv %s392_s18 }
  0x63   :  { %v143_v41 = vadd.f32 %v142_v37, %v139_v34  ;;  %s226_s25 = sld [smem:[#allocation9 + $0x5]]  ;;  %v167_v49 = vstv %s394_s19 }
  0x64   :  { %v158_v43 = vadd.f32 %v157_v38, %v154_v40  ;;  %s227_s4 = sld [smem:[#allocation10 + $0x2]]  ;;  %v171_v60 = vstv %s397_s20 }
  0x65   :  { %v146_v44 = vadd.f32 %v145_v39, %v143_v41  ;;  %v175_v47 = vstv %s221_s21 }
  0x66   :  { %v161_v45 = vadd.f32 %v160_v42, %v158_v43  ;;  %v178_v50 = vstv %s222_s22 }
  0x67   :  { %v147_v48 = vmax.f32 %v146_v44, 0.0  ;;  %v182_v61 = vstv %s399_s23 }
  0x68   :  { %v162_v51 = vmax.f32 %v161_v45, 0.0  ;;  %v187_v52 = vstv %s225_s24 }
  0x69   :  { %v165_v53 = vmul.f32 %v164_v46, %v147_v48  ;;  %v176_v54 = vmul.f32 %v175_v47, %v147_v48  ;;  %v188_v55 = vmul.f32 %v187_v52, %v147_v48  ;;  %v190_v56 = vstv %s226_s25 }
  0x6a   :  { %v168_v57 = vmul.f32 %v167_v49, %v162_v51  ;;  %v179_v58 = vmul.f32 %v178_v50, %v162_v51  ;;  %v191_v59 = vmul.f32 %v190_v56, %v162_v51  ;;  %v194_v62 = vstv %s227_s4 }
  0x6c   :  { %v169_v63 = vadd.f32 %v168_v57, %v165_v53  ;;  %v180_v0 = vadd.f32 %v179_v58, %v176_v54  ;;  %v192_v1 = vadd.f32 %v191_v59, %v188_v55 }
  0x6e   :  { %v172_v2 = vadd.f32 %v171_v60, %v169_v63  ;;  %v183_v3 = vadd.f32 %v182_v61, %v180_v0  ;;  %v195_v4 = vadd.f32 %v194_v62, %v192_v1 }
  0x70   :  { %173 = vst [vmem:[%s422_s7] ss:$4 sm:$0xff] %v172_v2  ;;  %224 = vst [vmem:[%s422_s7 + $0x1] ss:$4 sm:$0xff] %v183_v3 }
  0x71   :  { %228 = vst [vmem:[%s422_s7 + $0x2] ss:$4 sm:$0xff] %v195_v4 }
  0x72   :  { %202 = vsyncpa [#allocation3], 1 }
  0x73   :  { %203 = vsyncpa [#allocation5], 1 }
  0x74   :  { %204 = vsyncpa [#allocation8], 1 }
  0x75   :  { %205 = vsyncpa [#allocation11], 1 }

</bundles_post_ra>
